<compile_context>
chip_gen: v7x
topology: tpu7x:2x2x1
jax: 0.10.0
libtpu: 0.0.40
codegen_flags: <defaults>
</compile_context>

<pallas_src>
import functools

import jax
import jax.numpy as jnp
from jax import lax
from jax.experimental import pallas as pl
from jax.experimental.pallas import tpu as pltpu

HEADS_FWD = 8              # forward() hard-codes self.heads = 8
HEADS_PER_STEP = 2         # heads computed (and interleaved) per grid step
LANE = 128                 # TPU lane width; pad the pixel axis to this
COMPUTE_DTYPE = jnp.bfloat16   # MXU operand dtype (accumulation stays f32)
NEG_INF = -1e30


def _mhsa_kernel(x_ref, w_ref, b_ref, pos_ref, o_ref, *, n_valid):
    # x_ref:   (1, C, Np)          one batch element, channels x padded pixels (bf16)
    # w_ref:   (HPG*3d, C)         this head-group's stacked [q;k;v] rows    (bf16)
    # b_ref:   (HPG*3d, 1)         matching biases                           (f32)
    # pos_ref: (HPG, d, Np)        this head-group's (rel_h + rel_w) rows    (bf16)
    # o_ref:   (1, HPG, d, Np)     per-head outputs                          (f32)
    f32 = jnp.float32
    cd = pos_ref.dtype
    hpg, d, n_pad = pos_ref.shape

    x = x_ref[0]                                                    # (C, Np)

    # One stacked projection matmul for the whole head group (M = HPG*3d),
    # f32 accumulation, bias added in f32.
    qkv = jnp.dot(w_ref[...], x, preferred_element_type=f32) + b_ref[...]

    if n_pad != n_valid:
        col = lax.broadcasted_iota(jnp.int32, (1, n_pad), 1)
        key_mask = jnp.where(col < n_valid, 0.0, NEG_INF).astype(f32)  # (1, Np)

    # Static unroll over the heads of this group: the LLO scheduler can
    # overlap head j's EUP/XLU softmax with head j+1's MXU matmuls.
    for j in range(hpg):
        base = j * 3 * d
        q = qkv[base:base + d]                                      # (d, Np) f32
        k = qkv[base + d:base + 2 * d]
        v = qkv[base + 2 * d:base + 3 * d]
        qc = q.astype(cd)
        kc = k.astype(cd)
        vc = v.astype(cd)
        p = pos_ref[j]                                              # (d, Np) bf16

        # energy[i, jj] = sum_c q[c, i] * k[c, jj] + sum_c p[c, i] * q[c, jj]
        # Two accumulating dot_generals (no concat copies), contraction on
        # the channel (major) dim of both operands.
        cn = (((0,), (0,)), ((), ()))
        energy = (lax.dot_general(qc, kc, cn, preferred_element_type=f32) +
                  lax.dot_general(p, qc, cn, preferred_element_type=f32))
        if n_pad != n_valid:
            energy = energy + key_mask          # kill padded key columns

        # Numerically-stable softmax over keys (f32); EUP approx reciprocal.
        m = jnp.max(energy, axis=-1, keepdims=True)
        e = jnp.exp(energy - m)
        s = jnp.sum(e, axis=-1, keepdims=True)
        att = e * pl.reciprocal(s, approx=True)                     # (Np, Np)

        # out[c, i] = sum_jj v[c, jj] * att[i, jj]   (A·t(B), both minor dims —
        # the canonical q·k^T-style contraction, no big transpose needed).
        out_j = lax.dot_general(vc, att.astype(cd),
                                (((1,), (1,)), ((), ())),
                                preferred_element_type=f32)          # (d, Np)
        o_ref[0, j] = out_j.astype(o_ref.dtype)


def mhsa_forward(x, params, *, heads_per_step=HEADS_PER_STEP):
    """x: (B, C, W, H) float32 (NCHW, as in PyTorch)."""
    B, C, W, H = x.shape
    heads = HEADS_FWD
    assert C % heads == 0, "n_dims must be divisible by 8 (forced self.heads)"
    d = C // heads
    assert heads % heads_per_step == 0
    hpg = heads_per_step
    N = W * H
    n_pad = ((N + LANE - 1) // LANE) * LANE
    cd = COMPUTE_DTYPE

    # Pad pixel axis to a lane multiple (zeros; padded keys are masked in-kernel).
    x_flat = x.reshape(B, C, N)
    if n_pad != N:
        x_flat = jnp.pad(x_flat, ((0, 0), (0, 0), (0, n_pad - N)))
    x_flat = x_flat.astype(cd)

    # Stack the three 1x1-conv projections per head: rows ordered
    # [head, (q|k|v), d] so each head-group's block is contiguous.
    def stack3(aq, ak, av, trail):
        return jnp.stack([aq.reshape((heads, d) + trail),
                          ak.reshape((heads, d) + trail),
                          av.reshape((heads, d) + trail)], axis=1)

    w_stack = stack3(params["wq"], params["wk"], params["wv"], (C,)) \
        .reshape(heads * 3 * d, C).astype(cd)
    b_stack = stack3(params["bq"], params["bk"], params["bv"], ()) \
        .reshape(heads * 3 * d, 1).astype(jnp.float32)

    # (rel_h + rel_w).view(1, 8, C//8, -1)  -> (heads, d, N), padded to Np.
    pos = (params["rel_h"] + params["rel_w"]).reshape(heads, d, N)
    if n_pad != N:
        pos = jnp.pad(pos, ((0, 0), (0, 0), (0, n_pad - N)))
    pos = pos.astype(cd)

    grid = (B, heads // hpg)

    # VMEM budget: double-buffered blocks + per-head f32 (Np, Np) softmax
    # intermediates (energy / e / att) with headroom; capped at 64 MiB (v7x).
    bytes_blocks = 2 * (C * n_pad * 2 + hpg * 3 * d * C * 2 + hpg * 3 * d * 4
                        + hpg * d * n_pad * 2 + hpg * d * n_pad * 4)
    bytes_interm = hpg * 4 * (n_pad * n_pad * 4 + 8 * d * n_pad * 4)
    vmem_limit = int(min(64 * 2**20,
                         max(4 * (bytes_blocks + bytes_interm), 32 * 2**20)))

    flops = int(2 * B * (3 * C) * C * n_pad                       # qkv projection
                + B * heads * 2 * (2 * d) * n_pad * n_pad          # energy (2 matmuls)
                + B * heads * 2 * d * n_pad * n_pad)               # PV
    cost = pl.CostEstimate(
        flops=flops,
        transcendentals=int(B * heads * n_pad * (n_pad + 1)),
        bytes_accessed=int(x_flat.size * 2 + w_stack.size * 2 + b_stack.size * 4
                           + pos.size * 2 + B * C * n_pad * 4))

    kernel = functools.partial(_mhsa_kernel, n_valid=N)

    out = pl.pallas_call(
        kernel,
        out_shape=jax.ShapeDtypeStruct((B, heads, d, n_pad), jnp.float32),
        grid_spec=pltpu.PrefetchScalarGridSpec(
            num_scalar_prefetch=0,
            grid=grid,
            in_specs=[
                # x: constant over the head-group axis -> fetched once per batch.
                pl.BlockSpec((1, C, n_pad), lambda b, g: (b, 0, 0)),
                pl.BlockSpec((hpg * 3 * d, C), lambda b, g: (g, 0)),
                pl.BlockSpec((hpg * 3 * d, 1), lambda b, g: (g, 0)),
                pl.BlockSpec((hpg, d, n_pad), lambda b, g: (g, 0, 0)),
            ],
            out_specs=pl.BlockSpec((1, hpg, d, n_pad),
                                   lambda b, g: (b, g, 0, 0)),
        ),
        compiler_params=pltpu.CompilerParams(
            dimension_semantics=("parallel", "parallel"),
            vmem_limit_bytes=vmem_limit),
        cost_estimate=cost,
    )(x_flat, w_stack, b_stack, pos)

    if n_pad != N:
        out = out[..., :N]          # drop padded query rows
    # .view(n_batch, C, width, height)
    return out.reshape(B, C, W, H)


def mhsa_reference(x, params):
    """Pure-JAX f32 reference matching the PyTorch forward exactly."""
    B, C, W, H = x.shape
    heads = HEADS_FWD
    d = C // heads
    N = W * H
    xf = x.reshape(B, C, N)

    def proj(w, b):
        return (jnp.einsum("oc,bcn->bon", w, xf) + b[None, :, None]) \
            .reshape(B, heads, d, N)

    q = proj(params["wq"], params["bq"])
    k = proj(params["wk"], params["bk"])
    v = proj(params["wv"], params["bv"])

    cc = jnp.einsum("bhci,bhcj->bhij", q, k)
    pos = (params["rel_h"] + params["rel_w"]).reshape(heads, d, N)
    cp = jnp.einsum("hci,bhcj->bhij", pos, q)
    energy = cc + cp
    att = jax.nn.softmax(energy, axis=-1)
    out = jnp.einsum("bhcj,bhij->bhci", v, att)
    return out.reshape(B, C, W, H)


def init_params(key, n_dims, width, height, heads_ctor=4):
    """Deterministic synthetic parameters matching the module's shapes."""
    ks = jax.random.split(key, 8)
    C = n_dims
    w_scale = 0.1
    rel_scale = 0.5   # keeps energies moderate so bf16 rounding stays < tol
    params = {
        # nn.Conv2d(C, C, kernel_size=1): weight (C, C, 1, 1) -> (C, C)
        "wq": jax.random.normal(ks[0], (C, C), jnp.float32) * w_scale,
        "bq": jax.random.normal(ks[1], (C,), jnp.float32) * w_scale,
        "wk": jax.random.normal(ks[2], (C, C), jnp.float32) * w_scale,
        "bk": jax.random.normal(ks[3], (C,), jnp.float32) * w_scale,
        "wv": jax.random.normal(ks[4], (C, C), jnp.float32) * w_scale,
        "bv": jax.random.normal(ks[5], (C,), jnp.float32) * w_scale,
        # rel_h: (1, heads_ctor, C//heads_ctor, 1, height)
        "rel_h": jax.random.normal(
            ks[6], (1, heads_ctor, C // heads_ctor, 1, height),
            jnp.float32) * rel_scale,
        # rel_w: (1, heads_ctor, C//heads_ctor, width, 1)
        "rel_w": jax.random.normal(
            ks[7], (1, heads_ctor, C // heads_ctor, width, 1),
            jnp.float32) * rel_scale,
        # gamma / gating_param exist in __init__ but are unused in forward().
    }
    return params


if __name__ == "__main__":
    key = jax.random.PRNGKey(0)
    B, C, W, H = 2, 64, 8, 8          # C must be divisible by 8 (forced heads)
    kx, kp = jax.random.split(key)
    x = jax.random.normal(kx, (B, C, W, H), jnp.float32)
    params = init_params(kp, n_dims=C, width=W, height=H, heads_ctor=4)

    out = jax.block_until_ready(mhsa_forward(x, params))
    ref = mhsa_reference(x, params)

    assert out.shape == (B, C, W, H)
    # Tolerance loosened (intentionally) for bf16 MXU operands + the EUP
    # approximate-reciprocal softmax normalization vs. the exact f32 reference.
    assert jnp.allclose(out, ref, rtol=3e-2, atol=3e-2), \
        float(jnp.max(jnp.abs(out - ref)))
    print("KERNEL_OK")
</pallas_src>

<mosaic_0001>
module attributes {stable_mosaic.version = 11 : i64} {
  func.func @_mhsa_kernel(%arg0: i32, %arg1: i32, %arg2: memref<1x64x128xbf16, #tpu.memory_space<vmem>>, %arg3: memref<48x64xbf16, #tpu.memory_space<vmem>>, %arg4: memref<48x1xf32, #tpu.memory_space<vmem>>, %arg5: memref<2x8x128xbf16, #tpu.memory_space<vmem>>, %arg6: memref<1x2x8x128xf32, #tpu.memory_space<vmem>>) attributes {dimension_semantics = [#tpu.dimension_semantics<parallel>, #tpu.dimension_semantics<parallel>], iteration_bounds = array<i64: 2, 4>, scalar_prefetch = 0 : i64, scratch_operands = 0 : i64, tpu.core_type = #tpu.core_type<tc>, window_params = [{transform_indices = @transform_0, window_bounds = array<i64: 1, 64, 128>}, {transform_indices = @transform_1, window_bounds = array<i64: 48, 64>}, {transform_indices = @transform_2, window_bounds = array<i64: 48, 1>}, {transform_indices = @transform_3, window_bounds = array<i64: 2, 8, 128>}, {transform_indices = @transform_4, window_bounds = array<i64: 1, 2, 8, 128>}]} {
    %c0 = arith.constant 0 : index
    %c0_0 = arith.constant 0 : index
    %c0_1 = arith.constant 0 : index
    %0 = vector.load %arg2[%c0, %c0_0, %c0_1] : memref<1x64x128xbf16, #tpu.memory_space<vmem>>, vector<1x64x128xbf16>
    %1 = vector.shape_cast %0 : vector<1x64x128xbf16> to vector<64x128xbf16>
    %c0_2 = arith.constant 0 : index
    %c0_3 = arith.constant 0 : index
    %2 = vector.load %arg3[%c0_2, %c0_3] : memref<48x64xbf16, #tpu.memory_space<vmem>>, vector<48x64xbf16>
    %cst = arith.constant dense<0.000000e+00> : vector<48x128xf32>
    %3 = tpu.matmul %2, %1, %cst {dimension_numbers = #tpu.dot_dimension_numbers<[1], [0], [0], [1], [0, 0, 1, 1], [], []>} : vector<48x64xbf16>, vector<64x128xbf16>, vector<48x128xf32> -> vector<48x128xf32>
    %c0_4 = arith.constant 0 : index
    %c0_5 = arith.constant 0 : index
    %4 = vector.load %arg4[%c0_4, %c0_5] : memref<48x1xf32, #tpu.memory_space<vmem>>, vector<48x1xf32>
    %5 = vector.broadcast %4 : vector<48x1xf32> to vector<48x128xf32>
    %6 = arith.addf %3, %5 : vector<48x128xf32>
    %7 = tpu.iota {dimensions = array<i32: 1>} : vector<1x128xi32>
    %c64_i32 = arith.constant 64 : i32
    %8 = vector.broadcast %c64_i32 : i32 to vector<1x128xi32>
    %9 = arith.cmpi slt, %7, %8 : vector<1x128xi32>
    %cst_6 = arith.constant 0.000000e+00 : f32
    %cst_7 = arith.constant -1.000000e+30 : f32
    %10 = vector.broadcast %cst_6 : f32 to vector<1x128xf32>
    %11 = vector.broadcast %cst_7 : f32 to vector<1x128xf32>
    %12 = arith.select %9, %10, %11 : vector<1x128xi1>, vector<1x128xf32>
    %13 = vector.extract_strided_slice %6 {offsets = [0, 0], sizes = [8, 128], strides = [1, 1]} : vector<48x128xf32> to vector<8x128xf32>
    %14 = vector.extract_strided_slice %6 {offsets = [8, 0], sizes = [8, 128], strides = [1, 1]} : vector<48x128xf32> to vector<8x128xf32>
    %15 = vector.extract_strided_slice %6 {offsets = [16, 0], sizes = [8, 128], strides = [1, 1]} : vector<48x128xf32> to vector<8x128xf32>
    %16 = arith.truncf %13 : vector<8x128xf32> to vector<8x128xbf16>
    %17 = arith.truncf %14 : vector<8x128xf32> to vector<8x128xbf16>
    %18 = arith.truncf %15 : vector<8x128xf32> to vector<8x128xbf16>
    %c0_8 = arith.constant 0 : index
    %c0_9 = arith.constant 0 : index
    %c0_10 = arith.constant 0 : index
    %19 = vector.load %arg5[%c0_8, %c0_9, %c0_10] : memref<2x8x128xbf16, #tpu.memory_space<vmem>>, vector<1x8x128xbf16>
    %20 = vector.shape_cast %19 : vector<1x8x128xbf16> to vector<8x128xbf16>
    %cst_11 = arith.constant dense<0.000000e+00> : vector<128x128xf32>
    %21 = tpu.matmul %16, %17, %cst_11 {dimension_numbers = #tpu.dot_dimension_numbers<[0], [0], [1], [1], [0, 1, 1, 1], [], []>} : vector<8x128xbf16>, vector<8x128xbf16>, vector<128x128xf32> -> vector<128x128xf32>
    %cst_12 = arith.constant dense<0.000000e+00> : vector<128x128xf32>
    %22 = tpu.matmul %20, %16, %cst_12 {dimension_numbers = #tpu.dot_dimension_numbers<[0], [0], [1], [1], [0, 1, 1, 1], [], []>} : vector<8x128xbf16>, vector<8x128xbf16>, vector<128x128xf32> -> vector<128x128xf32>
    %23 = arith.addf %21, %22 : vector<128x128xf32>
    %24 = vector.broadcast %12 : vector<1x128xf32> to vector<128x128xf32>
    %25 = arith.addf %23, %24 : vector<128x128xf32>
    %cst_13 = arith.constant dense<0xFF800000> : vector<128xf32>
    %26 = vector.multi_reduction <maximumf>, %25, %cst_13 [1] : vector<128x128xf32> to vector<128xf32>
    %27 = vector.shape_cast %26 : vector<128xf32> to vector<128x1xf32>
    %28 = vector.broadcast %27 : vector<128x1xf32> to vector<128x128xf32>
    %29 = arith.subf %25, %28 : vector<128x128xf32>
    %30 = math.exp %29 : vector<128x128xf32>
    %cst_14 = arith.constant dense<0.000000e+00> : vector<128xf32>
    %31 = vector.multi_reduction <add>, %30, %cst_14 [1] : vector<128x128xf32> to vector<128xf32>
    %32 = vector.shape_cast %31 : vector<128xf32> to vector<128x1xf32>
    %33 = tpu.reciprocal %32 {approx = true} : vector<128x1xf32> -> vector<128x1xf32>
    %34 = vector.broadcast %33 : vector<128x1xf32> to vector<128x128xf32>
    %35 = arith.mulf %30, %34 : vector<128x128xf32>
    %36 = arith.truncf %35 : vector<128x128xf32> to vector<128x128xbf16>
    %cst_15 = arith.constant dense<0.000000e+00> : vector<8x128xf32>
    %37 = tpu.matmul %18, %36, %cst_15 {dimension_numbers = #tpu.dot_dimension_numbers<[1], [1], [0], [0], [0, 0, 1, 0], [], []>} : vector<8x128xbf16>, vector<128x128xbf16>, vector<8x128xf32> -> vector<8x128xf32>
    %c0_16 = arith.constant 0 : index
    %c0_17 = arith.constant 0 : index
    %c0_18 = arith.constant 0 : index
    %c0_19 = arith.constant 0 : index
    %38 = vector.load %arg6[%c0_16, %c0_17, %c0_18, %c0_19] : memref<1x2x8x128xf32, #tpu.memory_space<vmem>>, vector<1x1x8x128xf32>
    %39 = vector.shape_cast %38 : vector<1x1x8x128xf32> to vector<8x128xf32>
    %40 = vector.shape_cast %37 : vector<8x128xf32> to vector<1x1x8x128xf32>
    tpu.vector_store %arg6[%c0_16, %c0_17, %c0_18, %c0_19], %40 {strides = array<i32>} : memref<1x2x8x128xf32, #tpu.memory_space<vmem>>, vector<1x1x8x128xf32>,
    %41 = vector.extract_strided_slice %6 {offsets = [24, 0], sizes = [8, 128], strides = [1, 1]} : vector<48x128xf32> to vector<8x128xf32>
    %42 = vector.extract_strided_slice %6 {offsets = [32, 0], sizes = [8, 128], strides = [1, 1]} : vector<48x128xf32> to vector<8x128xf32>
    %43 = vector.extract_strided_slice %6 {offsets = [40, 0], sizes = [8, 128], strides = [1, 1]} : vector<48x128xf32> to vector<8x128xf32>
    %44 = arith.truncf %41 : vector<8x128xf32> to vector<8x128xbf16>
    %45 = arith.truncf %42 : vector<8x128xf32> to vector<8x128xbf16>
    %46 = arith.truncf %43 : vector<8x128xf32> to vector<8x128xbf16>
    %c1 = arith.constant 1 : index
    %c0_20 = arith.constant 0 : index
    %c0_21 = arith.constant 0 : index
    %47 = vector.load %arg5[%c1, %c0_20, %c0_21] : memref<2x8x128xbf16, #tpu.memory_space<vmem>>, vector<1x8x128xbf16>
    %48 = vector.shape_cast %47 : vector<1x8x128xbf16> to vector<8x128xbf16>
    %cst_22 = arith.constant dense<0.000000e+00> : vector<128x128xf32>
    %49 = tpu.matmul %44, %45, %cst_22 {dimension_numbers = #tpu.dot_dimension_numbers<[0], [0], [1], [1], [0, 1, 1, 1], [], []>} : vector<8x128xbf16>, vector<8x128xbf16>, vector<128x128xf32> -> vector<128x128xf32>
    %cst_23 = arith.constant dense<0.000000e+00> : vector<128x128xf32>
    %50 = tpu.matmul %48, %44, %cst_23 {dimension_numbers = #tpu.dot_dimension_numbers<[0], [0], [1], [1], [0, 1, 1, 1], [], []>} : vector<8x128xbf16>, vector<8x128xbf16>, vector<128x128xf32> -> vector<128x128xf32>
    %51 = arith.addf %49, %50 : vector<128x128xf32>
    %52 = vector.broadcast %12 : vector<1x128xf32> to vector<128x128xf32>
    %53 = arith.addf %51, %52 : vector<128x128xf32>
    %cst_24 = arith.constant dense<0xFF800000> : vector<128xf32>
    %54 = vector.multi_reduction <maximumf>, %53, %cst_24 [1] : vector<128x128xf32> to vector<128xf32>
    %55 = vector.shape_cast %54 : vector<128xf32> to vector<128x1xf32>
    %56 = vector.broadcast %55 : vector<128x1xf32> to vector<128x128xf32>
    %57 = arith.subf %53, %56 : vector<128x128xf32>
    %58 = math.exp %57 : vector<128x128xf32>
    %cst_25 = arith.constant dense<0.000000e+00> : vector<128xf32>
    %59 = vector.multi_reduction <add>, %58, %cst_25 [1] : vector<128x128xf32> to vector<128xf32>
    %60 = vector.shape_cast %59 : vector<128xf32> to vector<128x1xf32>
    %61 = tpu.reciprocal %60 {approx = true} : vector<128x1xf32> -> vector<128x1xf32>
    %62 = vector.broadcast %61 : vector<128x1xf32> to vector<128x128xf32>
    %63 = arith.mulf %58, %62 : vector<128x128xf32>
    %64 = arith.truncf %63 : vector<128x128xf32> to vector<128x128xbf16>
    %cst_26 = arith.constant dense<0.000000e+00> : vector<8x128xf32>
    %65 = tpu.matmul %46, %64, %cst_26 {dimension_numbers = #tpu.dot_dimension_numbers<[1], [1], [0], [0], [0, 0, 1, 0], [], []>} : vector<8x128xbf16>, vector<128x128xbf16>, vector<8x128xf32> -> vector<8x128xf32>
    %c0_27 = arith.constant 0 : index
    %c1_28 = arith.constant 1 : index
    %c0_29 = arith.constant 0 : index
    %c0_30 = arith.constant 0 : index
    %66 = vector.load %arg6[%c0_27, %c1_28, %c0_29, %c0_30] : memref<1x2x8x128xf32, #tpu.memory_space<vmem>>, vector<1x1x8x128xf32>
    %67 = vector.shape_cast %66 : vector<1x1x8x128xf32> to vector<8x128xf32>
    %68 = vector.shape_cast %65 : vector<8x128xf32> to vector<1x1x8x128xf32>
    tpu.vector_store %arg6[%c0_27, %c1_28, %c0_29, %c0_30], %68 {strides = array<i32>} : memref<1x2x8x128xf32, #tpu.memory_space<vmem>>, vector<1x1x8x128xf32>,
    return
  }
  func.func @transform_0(%arg0: i32, %arg1: i32) -> (i32, i32, i32) {
    %c0_i32 = arith.constant 0 : i32
    %c0_i32_0 = arith.constant 0 : i32
    %c0_i32_1 = arith.constant 0 : i32
    return %arg0, %c0_i32, %c0_i32_0 : i32, i32, i32
  }
  func.func @transform_1(%arg0: i32, %arg1: i32) -> (i32, i32) {
    %c0_i32 = arith.constant 0 : i32
    %c0_i32_0 = arith.constant 0 : i32
    return %arg1, %c0_i32 : i32, i32
  }
  func.func @transform_2(%arg0: i32, %arg1: i32) -> (i32, i32) {
    %c0_i32 = arith.constant 0 : i32
    %c0_i32_0 = arith.constant 0 : i32
    return %arg1, %c0_i32 : i32, i32
  }
  func.func @transform_3(%arg0: i32, %arg1: i32) -> (i32, i32, i32) {
    %c0_i32 = arith.constant 0 : i32
    %c0_i32_0 = arith.constant 0 : i32
    %c0_i32_1 = arith.constant 0 : i32
    return %arg1, %c0_i32, %c0_i32_0 : i32, i32, i32
  }
  func.func @transform_4(%arg0: i32, %arg1: i32) -> (i32, i32, i32, i32) {
    %c0_i32 = arith.constant 0 : i32
    %c0_i32_0 = arith.constant 0 : i32
    %c0_i32_1 = arith.constant 0 : i32
    return %arg0, %arg1, %c0_i32, %c0_i32_0 : i32, i32, i32, i32
  }
}

</mosaic_0001>

<bundles_post_ra>
// kernel: tpu_custom_call.1
= control target key start
LH: loop header
LB: loop body
LE: loop exit
PB: predicated region body
PF: predicated region fallthrough
CT: control target
= control target key end

     0   :  { %s2736_s0 = inlined_call_operand.vmem [shape: bf16[2,64,128], index: 0, kind: input, shape index: {}]   ;;  %s2737_s1 = inlined_call_operand.vmem [shape: bf16[192,64], index: 1, kind: input, shape index: {}]   ;;  %s2738_s2 = inlined_call_operand.vmem [shape: f32[192,1], index: 2, kind: input, shape index: {}]   ;;  %s2739_s3 = inlined_call_operand.vmem [shape: bf16[8,8,128], index: 3, kind: input, shape index: {}]   ;;  %s2740_s4 = inlined_call_operand.hbm [shape: f32[2,8,8,128], index: 4, kind: output, shape index: {}]  }
   0x1   :  { %2742 = sst [smem:[#allocation6_spill]] %s2736_s0 }
   0x2   :  { %9 = vsyncpa [#allocation3], 0 }
   0x3   :  { %11 = vsyncpa [#allocation3 + $0x1], 0  ;;  %s2190_s15 = smov 0   ;;  %s2192_s16 = smov 0  }
   0x4   :  { %s2194_s17 = smov 0   ;;  %s2196_s18 = smov 0  }
   0x5   :  { %s2198_s19 = smov 0   ;;  %s2200_s20 = smov 0  }
   0x6   :  { %s2202_s21 = smov 0   ;;  %s2204_s22 = smov 0  }
   0x7 LB: > { %s1556_s23 = sadd.s32 4294967295, %s2156_s22   ;;  %s1557_s24 = sadd.s32 4294967294, %s2156_s22   ;;  %s2156_s22 = sphi %s2204_s22, %s17_s22   ;;  %s2152_s21 = sphi %s2202_s21, %s2754_s21   ;;  %s2148_s20 = sphi %s2200_s20, %s2753_s20   ;;  %s2144_s19 = sphi %s2198_s19, %s2752_s19   ;;  %s2140_s18 = sphi %s2196_s18, %s2751_s18   ;;  %s2136_s17 = sphi %s2194_s17, %s2750_s17   ;;  %s2132_s16 = sphi %s2192_s16, %s2749_s16   ;;  %s2128_s15 = sphi %s2190_s15, %s2748_s15  }
   0x8   : > { %s26_s25 = sadd.s32 1, %s2148_s20  ;;  %s29_s26 = sadd.s32 1, %s2152_s21 }
   0x9   : > { %p27_p0 = scmp.ge.s32.totalorder %s26_s25, 4  ;;  %p152_p1 = scmp.ne.s32.totalorder %s2136_s17, %s2132_s16 }
   0xa   : > { %p153_p2 = scmp.eq.s32.totalorder %s1556_s23, 7  ;;  %p158_p5 = scmp.ne.s32.totalorder %s2132_s16, %s2128_s15 }
   0xb   : > { %s2756_s25 = smov (%p27_p0, %s26_s25), 0  ;;  %s2758_s26 = smov (!%p27_p0, %s29_s26), %s2152_s21 }
   0xc   : > { %s138_s27 = ssub.s32 %s2148_s20, %s2756_s25  ;;  %p2241_p3 = por %p153_p2, %p152_p1 }
   0xd   : > { %p31_p4 = scmp.ge.s32.totalorder %s2758_s26, 2  ;;  %p159_p6 = scmp.eq.s32.totalorder %s1557_s24, 7 }
   0xe   : > { %p1560_p7 = scmp.ge.s32.totalorder %s2156_s22, 1  ;;  %p212_p9 = scmp.lt.s32.totalorder %s2156_s22, 9 }
   0xf   : > { %s2760_s26 = smov (%p31_p4, %s2758_s26), 0  ;;  %p2250_p8 = por %p159_p6, %p158_p5 }
  0x10   : > { %2744 = sst [smem:[#allocation5_spill]] %s2760_s26  ;;  %s137_s30 = ssub.s32 %s2152_s21, %s2760_s26 }
  0x11   : > { %s142_s5 = sadd.s32 1, %s2136_s17  ;;  %s139_s6 = sor.u32 %s138_s27, %s137_s30 }
  0x12   : > { %p213_p10 = pnand %p1560_p7, %p212_p9  ;;  %p140_p11 = scmp.eq.s32.totalorder %s139_s6, 0 }
  0x13   : > { %p253_p12 = scmp.lt.s32.totalorder (!%p213_p10), %s2144_s19, 1  ;;  %s258_s8 = smul.u32 (!%p213_p10), 6, %s2140_s18  ;;  %v2158_v0 = vmov (!%p213_p10), 0.0   ;;  %vm2159_vm0 = vmmov (!%p213_p10), 0   ;;  %v2160_v1 = vmov (!%p213_p10), 0   ;;  %vm367_vm1 = vcmask (!%p213_p10), 523264  }
  0x14   : > { %s2259_s7 = scalar_select %p140_p11, %s2136_s17, %s142_s5  }
  0x15   : > { %216 = sbr.rel (%p213_p10) target bundleno = 1342 (0x53e), region = 36  ;;  %1680 = vmatprep.subr.bf16.mxu0 (!%p213_p10), %v2158_v0  ;;  %1688 = vmatprep.mubr.msk.bf16.mxu0 (!%p213_p10), %vm2159_vm0, %v2158_v0  ;;  %s2267_s9 = sshll.u32 (!%p213_p10), %s2140_s18, 1  ;;  %vm458_vm2 = vcmask (!%p213_p10), 64512   ;;  %vm483_vm3 = vcmask (!%p213_p10), 1043456  }
  0x16   : > { %1925 = vset.pattern.permute.xlu0 (!%p213_p10), %v2160_v1  ;;  %p259_p13 = scmp.lt.s32.totalorder (!%p213_p10), %s258_s8, 23  ;;  %p271_p0 = scmp.lt.s32.totalorder (!%p213_p10), %s2267_s9, 7 }
  0x17   : > { %s2746_s0 = sld [smem:[#allocation6_spill]] (!%p213_p10) }
  0x1c   : > { %s254_s10 = scalar_select %p253_p12, %s2144_s19, 1 }
  0x1d   : > { %s2762_s8 = smov (!%p259_p13, %s258_s8), 23 }
  0x1e   : > { %s1618_s11 = sshll.u32 %s254_s10, 5  ;;  %s1564_s24 = sshll.u32 %s2762_s8, 2 }
  0x1f   : > { %s257_s14 = scalar_lea.vmem %s2746_s0, %s1618_s11  ;;  %s262_s30 = scalar_lea.vmem %s2737_s1, %s1564_s24 }
  0x20   : > { %v1927_v2 = vld [vmem:[%s257_s14] sm:$0xff]   ;;  %s272_s23 = scalar_select %p271_p0, %s2267_s9, 7  ;;  %v1928_v3 = vld [vmem:[%s257_s14 + $0x8] sm:$0xff]   ;;  %v1929_v4 = vld [vmem:[%s257_s14 + $0x10] sm:$0xff]  }
  0x21   : > { %1681 = vmatpush3.bf16.msra.mxu0 %v1927_v2  ;;  %s1565_s5 = sshll.u32 %s2762_s8, 3  ;;  %v1930_v8 = vld [vmem:[%s257_s14 + $0x18] sm:$0xff]   ;;  %v1931_v9 = vld [vmem:[%s262_s30] sm:$0xff]   ;;  %v1932_v10 = vld [vmem:[%s262_s30 + $0x8] sm:$0xff]   ;;  %s1614_s14 = sshll.u32 %s2144_s19, 3 }
  0x22   : > { %1682 = vmatprep.subr.bf16.mxu0 %v2158_v0  ;;  %s2282_s10 = scalar_lea.vmem %s2738_s2, %s1565_s5  ;;  %s1567_s11 = sshll.u32 %s272_s23, 2  ;;  %v1933_v11 = vld [vmem:[%s262_s30 + $0x10] sm:$0xff]  }
  0x23   : > { %s2287_s0 = scalar_lea.vmem %s2739_s3, %s1567_s11  ;;  %v292_v5 = vld [vmem:[%s2282_s10] sm:$0xff]  ;;  %v293_v7 = vld [vmem:[%s2282_s10 + $0x8] sm:$0xff]  ;;  %v295_v12 = vld [vmem:[%s2282_s10 + $0x18] sm:$0xff]  ;;  %s1441_s23 = sadd.s32 %s1614_s14, %s2267_s9 }
  0x24   : > { %v441_v6 = vld [vmem:[%s2287_s0] sm:$0xf]  ;;  %300 = vperm.xlu0 %1925, %v292_v5   ;;  %v1594_v43 = vld [vmem:[%s2287_s0 + $0x4] sm:$0xf]  ;;  %s250_s0 = sand.u32 1, %s2132_s16   ;;  %s1615_s24 = sshll.u32 %s1441_s23, 7 }
  0x25   : > { %1683 = vmatpush3.bf16.msra.mxu0 %v1928_v3  ;;  %442 = vxpose.xlu1.c.b16.start.end [1/1] (short) %v441_v6, 128  ;;  %v296_v13 = vld [vmem:[%s2282_s10 + $0x20] sm:$0xff]  ;;  %s1561_s26 = sshll.u32 %s250_s0, 4  ;;  %s2680_s5 = scalar_lea.hbm %s2740_s4, %s1615_s24 }
  0x26   : > { %1684 = vmatprep.subr.bf16.mxu0 %v2158_v0  ;;  %s252_s8 = scalar_lea.vmem [#allocation2], %s1561_s26  ;;  %s2684_s6 = scalar_lea.sflag [#allocation3], %s250_s0 }
  0x27   : > { %s1444_s18 = sshll.u32 %s252_s8, 4  ;;  %s2162_s9 = smov [#allocation2]   ;;  %s2682_s18 = int_to_ptr.vmem [resolvable:$true] %s1444_s18 }
  0x28   : > { %305 = vperm.xlu0 %1925, %v293_v7   ;;  %s2062_s19 = scalar_lea.vmem %s2682_s18, 256 }
  0x29   : > { %1685 = vmatpush3.bf16.msra.mxu0 %v1929_v4  ;;  %1926 = vset.pattern.permute.xlu1 %v2160_v1  ;;  %p2063_p1 = scmp.ne.s32.totalorder %s2682_s18, %s2062_s19 }
  0x2a   : > { %1686 = vmatprep.subr.bf16.mxu0 %v2158_v0 }
  0x2b   : > { %p2064_p2 = pnand %p2063_p1, %p2241_p3 }
  0x2d   : > { %1687 = vmatpush3.bf16.msra.mxu0 %v1930_v8  ;;  %p2065_p4 = pneg %p2064_p2 }
  0x2e   : > { %1736 = vmatprep.subr.bf16.mxu0 %v2158_v0 }
  0x30   : > { %1689 = vmatmul.mubr.msk.bf16.vlgmr.msra.gmra.mrb[0].mxu0 %vm367_vm1, %v1931_v9 }
  0x31   : > { %1692 = vmatprep.mubr.msk.bf16.mxu0 %vm2159_vm0, %v2158_v0 }
  0x38   : > { %1693 = vmatmul.mubr.msk.bf16.gmra.mrb[4].mxu0 %vm367_vm1, %v1932_v10 }
  0x39   : > { %1696 = vmatprep.mubr.msk.bf16.mxu0 %vm2159_vm0, %v2158_v0 }
  0x40   : > { %1697 = vmatmul.mubr.msk.bf16.gmra.mrb[8].mxu0 %vm367_vm1, %v1933_v11 }
  0x41   : > { %1752 = vmatprep.mubr.msk.bf16.mxu0 %vm2159_vm0, %v2158_v0 }
  0x45   : > { %315 = vperm.xlu1 %1926, %v295_v12   ;;  %v434_v12 = vlaneseq }
  0x49   : > { %320 = vperm.xlu1 %1926, %v296_v13   ;;  %v435_v13 = vand.u32 127, %v434_v12 }
  0x4b   : > { %vm436_vm4 = vcmp.lt.s32.totalorder %v435_v13, 64 }
  0x8b   : > { %v450_v14 = vpop.trf.xlu1 }
  0x8c   : > { %1702 = vmatprep.mubr.msk.bf16.mxu1 %vm458_vm2, %v450_v14  ;;  %v2161_v14 = vmov -1e+30  }
  0x8f   : > { %v451_v15 = vpop.trf.xlu1 }
  0x93   : > { %v452_v16 = vpop.trf.xlu1 }
  0x97   : > { %v453_v17 = vpop.trf.xlu1 }
  0x9b   : > { %v454_v18 = vpop.trf.xlu1 }
  0x9f   : > { %v455_v19 = vpop.trf.xlu1 }
  0xa3   : > { %v301_v20 = vpop.permute.xlu0 %300  ;;  %v456_v21 = vpop.trf.xlu1 }
  0xa7   : > { %v306_v23 = vpop.permute.xlu0 %305  ;;  %v457_v27 = vpop.trf.xlu1 }
  0xc4   : > { %v316_v34 = vpop.permute.xlu1 %315 }
  0xc8   : > { %v321_v46 = vpop.permute.xlu1 %320 }
 0x103   : > { %v411_v22 = vpop.f32.mrb[0].mxu0 }
 0x104   : > { %v412_v24 = vadd.f32 %v411_v22, %v301_v20  ;;  %v1690_v25 = vpop.f32.mrb[1].mxu0 }
 0x105   : > { %v414_v26 = vpop.f32.mrb[2].mxu0 }
 0x106   : > { %v438_v28 = vpack.c.bf16 %v412_v24, %v412_v24  ;;  %v415_v29 = vadd.f32 %v414_v26, %v306_v23  ;;  %v1691_v30 = vpop.f32.mrb[3].mxu0 }
 0x108   : > { %v439_v31 = vpack.c.bf16 %v415_v29, %v415_v29  ;;  %584 = vxpose.xlu0.c.b16.start.end [1/1] (short) %v438_v28, 128  ;;  %1844 = vmatprep.subr.msk.bf16.mxu1 %vm483_vm3, %v438_v28  ;;  %v485_v32 = vsel %vm483_vm3, %v438_v28, 0 }
 0x109   : > { %1701 = vmatpush3.bf16.msra.mxu1 %v485_v32 }
 0x10a   : > { %1845 = vmatprep.subr.msk.bf16.mxu1 %vm483_vm3, %v439_v31  ;;  %v625_v35 = vsel %vm483_vm3, %v439_v31, 0 }
 0x10b   : > { %v2307_v33 = vpop.f32.mrb[4].mxu0 }
 0x10c   : > { %1703 = vmatmul.mubr.msk.bf16.vlgmr.msra.gmra.mrb[0].mxu1 %vm458_vm2, %v451_v15  ;;  %v1694_v36 = vpop.f32.mrb[5].mxu0  ;;  %v2348_v15 = vsel %vm436_vm4, 0.0, %v2161_v14 }
 0x10d   : > { %1719 = vmatpush3.bf16.msra.mxu1 %v625_v35  ;;  %v422_v37 = vpop.f32.mrb[6].mxu0  ;;  %1706 = vmatprep.mubr.msk.bf16.mxu1 %vm458_vm2, %v452_v16 }
 0x10e   : > { %v423_v38 = vadd.f32 %v422_v37, %v316_v34  ;;  %v1695_v39 = vpop.f32.mrb[7].mxu0 }
 0x110   : > { %v933_v40 = vpack.c.bf16 %v423_v38, %v423_v38 }
 0x112   : > { %1078 = vxpose.xlu1.c.b16.start.end [1/1] (short) %v933_v40, 128  ;;  %1846 = vmatprep.subr.msk.bf16.mxu1 %vm483_vm3, %v933_v40  ;;  %v979_v50 = vsel %vm483_vm3, %v933_v40, 0 }
 0x113   : > { %v427_v41 = vpop.f32.mrb[8].mxu0 }
 0x114   : > { %1707 = vmatmul.mubr.msk.bf16.gmra.mrb[4].mxu1 %vm458_vm2, %v453_v17  ;;  %v1698_v42 = vpop.f32.mrb[9].mxu0  ;;  %v428_v47 = vadd.f32 %v427_v41, %v321_v46 }
 0x115   : > { %1710 = vmatprep.mubr.msk.bf16.mxu1 %vm458_vm2, %v454_v18  ;;  %v2319_v44 = vpop.f32.mrb[10].mxu0 }
 0x116   : > { %v1699_v45 = vpop.f32.mrb[11].mxu0  ;;  %v934_v49 = vpack.c.bf16 %v428_v47, %v428_v47 }
 0x118   : > { %v1119_v60 = vsel %vm483_vm3, %v934_v49, 0 }
 0x11c   : > { %1711 = vmatmul.mubr.msk.bf16.gmra.mrb[8].mxu1 %vm458_vm2, %v455_v19 }
 0x11d   : > { %1714 = vmatprep.mubr.msk.bf16.mxu1 %vm458_vm2, %v456_v21 }
 0x124   : > { %1715 = vmatmul.mubr.msk.bf16.gmra.mrb[12].mxu1 %vm458_vm2, %v457_v27 }
 0x125   : > { %938 = vxpose.xlu0.c.b16.start.end [1/1] (short) %v1594_v43, 128 }
 0x16e   : > { %v592_v48 = vpop.trf.xlu0 }
 0x16f   : > { %1720 = vmatprep.mubr.msk.bf16.mxu1 %vm458_vm2, %v592_v48 }
 0x172   : > { %v593_v51 = vpop.trf.xlu0 }
 0x173   : > { %1721 = vmatmul.mubr.msk.bf16.vlgmr.msra.gmra.mrb[0].mxu1 %vm458_vm2, %v593_v51 }
 0x174   : > { %1757 = vmatpush3.bf16.msra.mxu1 %v979_v50 }
 0x175   : > { %1847 = vmatprep.subr.msk.bf16.mxu1 %vm483_vm3, %v934_v49 }
 0x176   : > { %v594_v52 = vpop.trf.xlu0 }
 0x177   : > { %1724 = vmatprep.mubr.msk.bf16.mxu1 %vm458_vm2, %v594_v52 }
 0x178   : > { %v1086_v1 = vpop.trf.xlu1 }
 0x17a   : > { %v595_v53 = vpop.trf.xlu0 }
 0x17b   : > { %1725 = vmatmul.mubr.msk.bf16.gmra.mrb[4].mxu1 %vm458_vm2, %v595_v53 }
 0x17c   : > { %v1087_v4 = vpop.trf.xlu1 }
 0x17e   : > { %v596_v54 = vpop.trf.xlu0 }
 0x17f   : > { %1728 = vmatprep.mubr.msk.bf16.mxu1 %vm458_vm2, %v596_v54 }
 0x180   : > { %v1088_v6 = vpop.trf.xlu1 }
 0x182   : > { %v597_v55 = vpop.trf.xlu0 }
 0x183   : > { %1729 = vmatmul.mubr.msk.bf16.gmra.mrb[8].mxu1 %vm458_vm2, %v597_v55 }
 0x184   : > { %v1089_v7 = vpop.trf.xlu1 }
 0x186   : > { %v598_v56 = vpop.trf.xlu0 }
 0x187   : > { %1732 = vmatprep.mubr.msk.bf16.mxu1 %vm458_vm2, %v598_v56 }
 0x188   : > { %v1090_v8 = vpop.trf.xlu1 }
 0x18a   : > { %v599_v57 = vpop.trf.xlu0 }
 0x18b   : > { %1733 = vmatmul.mubr.msk.bf16.gmra.mrb[12].mxu1 %vm458_vm2, %v599_v57 }
 0x18c   : > { %v1091_v9 = vpop.trf.xlu1 }
 0x18e   : > { %v946_v58 = vpop.trf.xlu0 }
 0x18f   : > { %1758 = vmatprep.mubr.msk.bf16.mxu1 %vm458_vm2, %v946_v58 }
 0x190   : > { %v1092_v10 = vpop.trf.xlu1 }
 0x192   : > { %v947_v59 = vpop.trf.xlu0 }
 0x193   : > { %1759 = vmatmul.mubr.msk.bf16.vlgmr.msra.gmra.mrb[16].mxu1 %vm458_vm2, %v947_v59 }
 0x194   : > { %1775 = vmatpush3.bf16.msra.mxu1 %v1119_v60  ;;  %v1093_v11 = vpop.trf.xlu1 }
 0x196   : > { %v948_v61 = vpop.trf.xlu0 }
 0x197   : > { %1762 = vmatprep.mubr.msk.bf16.mxu1 %vm458_vm2, %v948_v61 }
 0x19a   : > { %v949_v62 = vpop.trf.xlu0 }
 0x19b   : > { %1763 = vmatmul.mubr.msk.bf16.gmra.mrb[20].mxu1 %vm458_vm2, %v949_v62 }
 0x19e   : > { %v950_v63 = vpop.trf.xlu0 }
 0x19f   : > { %1766 = vmatprep.mubr.msk.bf16.mxu1 %vm458_vm2, %v950_v63 }
 0x1a2   : > { %v951_v2 = vpop.trf.xlu0 }
 0x1a3   : > { %1767 = vmatmul.mubr.msk.bf16.gmra.mrb[24].mxu1 %vm458_vm2, %v951_v2 }
 0x1a6   : > { %v952_v3 = vpop.trf.xlu0 }
 0x1a7   : > { %1770 = vmatprep.mubr.msk.bf16.mxu1 %vm458_vm2, %v952_v3 }
 0x1aa   : > { %v953_v5 = vpop.trf.xlu0 }
 0x1ab   : > { %1771 = vmatmul.mubr.msk.bf16.gmra.mrb[28].mxu1 %vm458_vm2, %v953_v5 }
 0x1ac   : > { %1776 = vmatprep.mubr.msk.bf16.mxu1 %vm458_vm2, %v1086_v1 }
 0x1b3   : > { %1777 = vmatmul.mubr.msk.bf16.vlgmr.msra.gmra.mrb[16].mxu1 %vm458_vm2, %v1087_v4 }
 0x1b4   : > { %1780 = vmatprep.mubr.msk.bf16.mxu1 %vm458_vm2, %v1088_v6 }
 0x1bb   : > { %1781 = vmatmul.mubr.msk.bf16.gmra.mrb[20].mxu1 %vm458_vm2, %v1089_v7 }
 0x1bc   : > { %1784 = vmatprep.mubr.msk.bf16.mxu1 %vm458_vm2, %v1090_v8 }
 0x1c3   : > { %1785 = vmatmul.mubr.msk.bf16.gmra.mrb[24].mxu1 %vm458_vm2, %v1091_v9 }
 0x1c4   : > { %1788 = vmatprep.mubr.msk.bf16.mxu1 %vm458_vm2, %v1092_v10 }
 0x1cb   : > { %1789 = vmatmul.mubr.msk.bf16.gmra.mrb[28].mxu1 %vm458_vm2, %v1093_v11 }
 0x246   : > { %v1722_v16 = vpop.f32.mrb[0].mxu1 }
 0x247   : > { %v661_v17 = vpop.f32.mrb[1].mxu1  ;;  %v2358_v22 = vadd.f32 %v1722_v16, %v2348_v15 }
 0x248   : > { %v2351_v18 = vadd.f32 %v661_v17, %v2348_v15  ;;  %v1723_v19 = vpop.f32.mrb[2].mxu1 }
 0x249   : > { %v664_v20 = vpop.f32.mrb[3].mxu1  ;;  %v2363_v25 = vadd.f32 %v1723_v19, %v2348_v15 }
 0x24a   : > { %v2354_v21 = vadd.f32 %v664_v20, %v2348_v15  ;;  %740 = vmax.xlane.f32.xlu0 %v2351_v18 }
 0x24c   : > { %742 = vmax.xlane.f32.xlu1 %v2354_v21 }
 0x24e   : > { %744 = vmax.xlane.f32.xlu0 %v2358_v22  ;;  %v1726_v23 = vpop.f32.mrb[4].mxu1 }
 0x24f   : > { %v677_v24 = vpop.f32.mrb[5].mxu1  ;;  %v2378_v34 = vadd.f32 %v1726_v23, %v2348_v15 }
 0x250   : > { %v1727_v26 = vpop.f32.mrb[6].mxu1  ;;  %v2370_v29 = vadd.f32 %v677_v24, %v2348_v15 }
 0x251   : > { %v680_v27 = vpop.f32.mrb[7].mxu1  ;;  %v2374_v30 = vadd.f32 %v1727_v26, %v2348_v15 }
 0x252   : > { %v2366_v28 = vadd.f32 %v680_v27, %v2348_v15  ;;  %746 = vmax.xlane.f32.xlu0 %v2363_v25 }
 0x254   : > { %750 = vmax.xlane.f32.xlu1 %v2366_v28 }
 0x256   : > { %748 = vmax.xlane.f32.xlu0 %v2370_v29  ;;  %v1730_v31 = vpop.f32.mrb[8].mxu1 }
 0x257   : > { %v693_v32 = vpop.f32.mrb[9].mxu1  ;;  %v2394_v42 = vadd.f32 %v1730_v31, %v2348_v15 }
 0x258   : > { %v1731_v35 = vpop.f32.mrb[10].mxu1  ;;  %754 = vmax.xlane.f32.xlu1 %v2374_v30  ;;  %v2386_v38 = vadd.f32 %v693_v32, %v2348_v15 }
 0x259   : > { %v696_v36 = vpop.f32.mrb[11].mxu1  ;;  %v2390_v39 = vadd.f32 %v1731_v35, %v2348_v15 }
 0x25a   : > { %v2382_v37 = vadd.f32 %v696_v36, %v2348_v15  ;;  %752 = vmax.xlane.f32.xlu0 %v2378_v34 }
 0x25c   : > { %758 = vmax.xlane.f32.xlu1 %v2382_v37 }
 0x25e   : > { %756 = vmax.xlane.f32.xlu0 %v2386_v38  ;;  %v1734_v40 = vpop.f32.mrb[12].mxu1 }
 0x25f   : > { %v709_v41 = vpop.f32.mrb[13].mxu1  ;;  %v2410_v49 = vadd.f32 %v1734_v40, %v2348_v15 }
 0x260   : > { %v1735_v43 = vpop.f32.mrb[14].mxu1  ;;  %762 = vmax.xlane.f32.xlu1 %v2390_v39  ;;  %v2402_v47 = vadd.f32 %v709_v41, %v2348_v15 }
 0x261   : > { %v712_v45 = vpop.f32.mrb[15].mxu1  ;;  %v2406_v48 = vadd.f32 %v1735_v43, %v2348_v15 }
 0x262   : > { %v2398_v46 = vadd.f32 %v712_v45, %v2348_v15  ;;  %760 = vmax.xlane.f32.xlu0 %v2394_v42 }
 0x264   : > { %766 = vmax.xlane.f32.xlu1 %v2398_v46 }
 0x266   : > { %764 = vmax.xlane.f32.xlu0 %v2402_v47 }
 0x268   : > { %770 = vmax.xlane.f32.xlu1 %v2406_v48 }
 0x26a   : > { %768 = vmax.xlane.f32.xlu0 %v2410_v49 }
 0x286   : > { %v1778_v50 = vpop.f32.mrb[16].mxu1 }
 0x287   : > { %v1155_v51 = vpop.f32.mrb[17].mxu1  ;;  %v2418_v55 = vadd.f32 %v1778_v50, %v2348_v15 }
 0x288   : > { %v2415_v52 = vadd.f32 %v1155_v51, %v2348_v15  ;;  %v1779_v53 = vpop.f32.mrb[18].mxu1 }
 0x289   : > { %v1158_v54 = vpop.f32.mrb[19].mxu1  ;;  %v2425_v57 = vadd.f32 %v1779_v53, %v2348_v15 }
 0x28a   : > { %v2421_v56 = vadd.f32 %v1158_v54, %v2348_v15  ;;  %1234 = vmax.xlane.f32.xlu0 %v2415_v52 }
 0x28c   : > { %1236 = vmax.xlane.f32.xlu1 %v2421_v56 }
 0x28e   : > { %1238 = vmax.xlane.f32.xlu0 %v2418_v55  ;;  %v1782_v58 = vpop.f32.mrb[20].mxu1 }
 0x28f   : > { %v2430_v59 = vadd.f32 %v1782_v58, %v2348_v15  ;;  %v1171_v60 = vpop.f32.mrb[21].mxu1 }
 0x290   : > { %1240 = vmax.xlane.f32.xlu1 %v2425_v57  ;;  %v1783_v61 = vpop.f32.mrb[22].mxu1  ;;  %v2434_v63 = vadd.f32 %v1171_v60, %v2348_v15 }
 0x291   : > { %v1174_v62 = vpop.f32.mrb[23].mxu1 }
 0x292   : > { %v2437_v1 = vadd.f32 %v1174_v62, %v2348_v15  ;;  %1246 = vmax.xlane.f32.xlu0 %v2430_v59 }
 0x294   : > { %1244 = vmax.xlane.f32.xlu1 %v2437_v1 }
 0x296   : > { %1242 = vmax.xlane.f32.xlu0 %v2434_v63  ;;  %v1786_v2 = vpop.f32.mrb[24].mxu1 }
 0x297   : > { %v1187_v3 = vpop.f32.mrb[25].mxu1  ;;  %v2480_v53 = vadd.f32 %v1786_v2, %v2348_v15 }
 0x298   : > { %v2442_v4 = vpop.f32.mrb[26].mxu1  ;;  %v2472_v50 = vadd.f32 %v1187_v3, %v2348_v15 }
 0x299   : > { %v1190_v5 = vpop.f32.mrb[27].mxu1 }
 0x29e   : > { %v2444_v6 = vpop.f32.mrb[28].mxu1 }
 0x29f   : > { %v2446_v7 = vpop.f32.mrb[29].mxu1 }
 0x2a0   : > { %v2448_v8 = vpop.f32.mrb[30].mxu1 }
 0x2a1   : > { %v2450_v9 = vpop.f32.mrb[31].mxu1 }
 0x2d7   : > { %v741_v10 = vpop.xlane.xlu0 %740 }
 0x2d8   : > { %v772_v11 = vsub.f32 %v2351_v18, %v741_v10 }
 0x2d9   : > { %v743_v12 = vpop.xlane.xlu1 %742 }
 0x2da   : > { %v788_v13 = vmul.f32 1.442695, %v772_v11  ;;  %v773_v14 = vsub.f32 %v2354_v21, %v743_v12 }
 0x2db   : > { %v745_v16 = vpop.xlane.xlu0 %744 }
 0x2dc   : > { %1934 = vpow2.f32 %v788_v13  ;;  %v790_v17 = vmul.f32 1.442695, %v773_v14  ;;  %v774_v19 = vsub.f32 %v2358_v22, %v745_v16  ;;  %v2501_v14 = vadd.f32 %v2442_v4, %v2348_v15 }
 0x2de   : > { %1936 = vpow2.f32 %v790_v17  ;;  %v792_v20 = vmul.f32 1.442695, %v774_v19  ;;  %v2507_v17 = vadd.f32 %v2446_v7, %v2348_v15 }
 0x2df   : > { %v747_v23 = vpop.xlane.xlu0 %746 }
 0x2e0   : > { %1938 = vpow2.f32 %v792_v20  ;;  %v775_v24 = vsub.f32 %v2363_v25, %v747_v23 }
 0x2e1   : > { %v751_v27 = vpop.xlane.xlu1 %750 }
 0x2e2   : > { %v794_v26 = vmul.f32 1.442695, %v775_v24  ;;  %v777_v21 = vsub.f32 %v2366_v28, %v751_v27 }
 0x2e3   : > { %v749_v31 = vpop.xlane.xlu0 %748 }
 0x2e4   : > { %v776_v18 = vsub.f32 %v2370_v29, %v749_v31  ;;  %1940 = vpow2.f32 %v794_v26  ;;  %v798_v41 = vmul.f32 1.442695, %v777_v21  ;;  %v2468_v29 = vadd.f32 %v1783_v61, %v2348_v15 }
 0x2e5   : > { %v755_v43 = vpop.xlane.xlu1 %754  ;;  %v2484_v61 = vadd.f32 %v1190_v5, %v2348_v15 }
 0x2e6   : > { %v2457_v32 = vpop.eup %1934  ;;  %v796_v36 = vmul.f32 1.442695, %v776_v18 }
 0x2e7   : > { %v753_v35 = vpop.xlane.xlu0 %752  ;;  %820 = vadd.xlane.f32.xlu0 %v2457_v32 }
 0x2e8   : > { %v2461_v22 = vpop.eup %1936  ;;  %v778_v40 = vsub.f32 %v2378_v34, %v753_v35  ;;  %1942 = vpow2.f32 %v796_v36  ;;  %v779_v34 = vsub.f32 %v2374_v30, %v755_v43  ;;  %v2538_v35 = vadd.f32 %v2448_v8, %v2348_v15 }
 0x2e9   : > { %822 = vadd.xlane.f32.xlu1 %v2461_v22  ;;  %1944 = vpow2.f32 %v798_v41  ;;  %v759_v54 = vpop.xlane.xlu1 %758 }
 0x2ea   : > { %v2465_v25 = vpop.eup %1938  ;;  %v800_v28 = vmul.f32 1.442695, %v778_v40  ;;  %v802_v60 = vmul.f32 1.442695, %v779_v34  ;;  %v781_v2 = vsub.f32 %v2382_v37, %v759_v54 }
 0x2eb   : > { %v757_v45 = vpop.xlane.xlu0 %756  ;;  %824 = vadd.xlane.f32.xlu0 %v2465_v25 }
 0x2ec   : > { %1946 = vpow2.f32 %v800_v28  ;;  %v780_v30 = vsub.f32 %v2386_v38, %v757_v45  ;;  %v806_v38 = vmul.f32 1.442695, %v781_v2 }
 0x2ed   : > { %1248 = vmax.xlane.f32.xlu1 %v2468_v29  ;;  %1948 = vpow2.f32 %v802_v60  ;;  %v763_v3 = vpop.xlane.xlu1 %762 }
 0x2ee   : > { %v2477_v51 = vpop.eup %1940  ;;  %v804_v12 = vmul.f32 1.442695, %v780_v30  ;;  %v783_v20 = vsub.f32 %v2390_v39, %v763_v3  ;;  %v2523_v39 = vadd.f32 %v2450_v9, %v2348_v15 }
 0x2ef   : > { %1250 = vmax.xlane.f32.xlu0 %v2472_v50  ;;  %v761_v58 = vpop.xlane.xlu0 %760 }
 0x2f0   : > { %v782_v5 = vsub.f32 %v2394_v42, %v761_v58  ;;  %1950 = vpow2.f32 %v804_v12  ;;  %v810_v7 = vmul.f32 1.442695, %v783_v20 }
 0x2f1   : > { %826 = vadd.xlane.f32.xlu1 %v2477_v51  ;;  %v767_v42 = vpop.xlane.xlu1 %766  ;;  %1952 = vpow2.f32 %v806_v38 }
 0x2f2   : > { %v2489_v62 = vpop.eup %1942  ;;  %v808_v37 = vmul.f32 1.442695, %v782_v5  ;;  %v785_v26 = vsub.f32 %v2398_v46, %v767_v42 }
 0x2f3   : > { %1254 = vmax.xlane.f32.xlu0 %v2480_v53  ;;  %v765_v10 = vpop.xlane.xlu0 %764  ;;  %v2493_v11 = vpop.eup %1944 }
 0x2f4   : > { %v784_v16 = vsub.f32 %v2402_v47, %v765_v10  ;;  %1954 = vpow2.f32 %v808_v37  ;;  %v2517_v47 = vadd.f32 %v2444_v6, %v2348_v15  ;;  %v814_v6 = vmul.f32 1.442695, %v785_v26 }
 0x2f5   : > { %1252 = vmax.xlane.f32.xlu1 %v2484_v61  ;;  %v771_v27 = vpop.xlane.xlu1 %770 }
 0x2f6   : > { %v2497_v13 = vpop.eup %1946  ;;  %v812_v23 = vmul.f32 1.442695, %v784_v16  ;;  %v787_v18 = vsub.f32 %v2406_v48, %v771_v27 }
 0x2f7   : > { %828 = vadd.xlane.f32.xlu0 %v2489_v62  ;;  %v769_v19 = vpop.xlane.xlu0 %768  ;;  %v2512_v4 = vpop.eup %1948 }
 0x2f8   : > { %v786_v24 = vsub.f32 %v2410_v49, %v769_v19  ;;  %1956 = vpow2.f32 %v812_v23  ;;  %v818_v21 = vmul.f32 1.442695, %v787_v18 }
 0x2f9   : > { %830 = vadd.xlane.f32.xlu1 %v2493_v11  ;;  %1958 = vpow2.f32 %v810_v7 }
 0x2fa   : > { %v816_v31 = vmul.f32 1.442695, %v786_v24  ;;  %v2527_v49 = vpop.eup %1950  ;;  %v294_v24 = vld [vmem:[%s2282_s10 + $0x10] sm:$0xff] }
 0x2fb   : > { %832 = vadd.xlane.f32.xlu0 %v2497_v13  ;;  %v2531_v46 = vpop.eup %1952 }
 0x2fc   : > { %1960 = vpow2.f32 %v816_v31 }
 0x2fd   : > { %1256 = vmax.xlane.f32.xlu1 %v2501_v14  ;;  %1962 = vpow2.f32 %v814_v6 }
 0x2fe   : > { %v2534_v9 = vpop.eup %1954  ;;  %1964 = vpow2.f32 %v818_v21 }
 0x2ff   : > { %1258 = vmax.xlane.f32.xlu0 %v2507_v17 }
 0x301   : > { %834 = vadd.xlane.f32.xlu1 %v2512_v4 }
 0x302   : > { %v2542_v48 = vpop.eup %1956 }
 0x303   : > { %1262 = vmax.xlane.f32.xlu0 %v2517_v47  ;;  %v2545_v36 = vpop.eup %1958 }
 0x305   : > { %1260 = vmax.xlane.f32.xlu1 %v2523_v39 }
 0x306   : > { %v2548_v40 = vpop.eup %1960 }
 0x307   : > { %836 = vadd.xlane.f32.xlu0 %v2527_v49  ;;  %v2551_v41 = vpop.eup %1962 }
 0x308   : > { %v2554_v8 = vpop.eup %1964 }
 0x309   : > { %838 = vadd.xlane.f32.xlu1 %v2531_v46 }
 0x30b   : > { %840 = vadd.xlane.f32.xlu0 %v2534_v9 }
 0x30d   : > { %1264 = vmax.xlane.f32.xlu1 %v2538_v35 }
 0x30f   : > { %844 = vadd.xlane.f32.xlu0 %v2542_v48 }
 0x311   : > { %842 = vadd.xlane.f32.xlu1 %v2545_v36 }
 0x313   : > { %848 = vadd.xlane.f32.xlu0 %v2548_v40 }
 0x315   : > { %846 = vadd.xlane.f32.xlu1 %v2551_v41 }
 0x317   : > { %v1235_v15 = vpop.xlane.xlu0 %1234 }
 0x318   : > { %v1266_v43 = vsub.f32 %v2415_v52, %v1235_v15 }
 0x319   : > { %v1237_v45 = vpop.xlane.xlu1 %1236  ;;  %850 = vadd.xlane.f32.xlu1 %v2554_v8 }
 0x31a   : > { %v1282_v28 = vmul.f32 1.442695, %v1266_v43  ;;  %v1267_v34 = vsub.f32 %v2421_v56, %v1237_v45 }
 0x31b   : > { %v1239_v54 = vpop.xlane.xlu0 %1238 }
 0x31c   : > { %1966 = vpow2.f32 %v1282_v28  ;;  %v1284_v58 = vmul.f32 1.442695, %v1267_v34  ;;  %v1268_v60 = vsub.f32 %v2418_v55, %v1239_v54 }
 0x31d   : > { %v1241_v30 = vpop.xlane.xlu1 %1240 }
 0x31e   : > { %1968 = vpow2.f32 %v1284_v58  ;;  %v1286_v2 = vmul.f32 1.442695, %v1268_v60  ;;  %v1269_v3 = vsub.f32 %v2425_v57, %v1241_v30 }
 0x31f   : > { %v1247_v10 = vpop.xlane.xlu0 %1246 }
 0x320   : > { %1970 = vpow2.f32 %v1286_v2  ;;  %v1288_v12 = vmul.f32 1.442695, %v1269_v3  ;;  %v1272_v52 = vsub.f32 %v2430_v59, %v1247_v10 }
 0x321   : > { %v1245_v5 = vpop.xlane.xlu1 %1244 }
 0x322   : > { %1972 = vpow2.f32 %v1288_v12  ;;  %v1294_v38 = vmul.f32 1.442695, %v1272_v52  ;;  %v1271_v56 = vsub.f32 %v2437_v1, %v1245_v5 }
 0x323   : > { %v1243_v37 = vpop.xlane.xlu0 %1242 }
 0x324   : > { %v1270_v16 = vsub.f32 %v2434_v63, %v1243_v37  ;;  %1974 = vpow2.f32 %v1294_v38  ;;  %v1292_v55 = vmul.f32 1.442695, %v1271_v56 }
 0x326   : > { %v2564_v42 = vpop.eup %1966  ;;  %v1290_v19 = vmul.f32 1.442695, %v1270_v16 }
 0x327   : > { %1314 = vadd.xlane.f32.xlu0 %v2564_v42 }
 0x328   : > { %v2567_v57 = vpop.eup %1968  ;;  %1976 = vpow2.f32 %v1290_v19 }
 0x329   : > { %1316 = vadd.xlane.f32.xlu1 %v2567_v57  ;;  %1978 = vpow2.f32 %v1292_v55 }
 0x32a   : > { %v2570_v59 = vpop.eup %1970 }
 0x32b   : > { %1318 = vadd.xlane.f32.xlu0 %v2570_v59 }
 0x32c   : > { %v2573_v1 = vpop.eup %1972 }
 0x32d   : > { %1320 = vadd.xlane.f32.xlu1 %v2573_v1 }
 0x32e   : > { %v2576_v63 = vpop.eup %1974 }
 0x331   : > { %1326 = vadd.xlane.f32.xlu1 %v2576_v63 }
 0x332   : > { %v2579_v20 = vpop.eup %1976 }
 0x333   : > { %1322 = vadd.xlane.f32.xlu0 %v2579_v20  ;;  %v2582_v23 = vpop.eup %1978 }
 0x335   : > { %1324 = vadd.xlane.f32.xlu1 %v2582_v23 }
 0x349   : > { %310 = vperm.xlu0 %1925, %v294_v24  }
 0x374   : > { %v821_v7 = vpop.xlane.xlu0 %820 }
 0x375   : > { %1980 = vrcp.f32 %v821_v7 }
 0x376   : > { %v823_v26 = vpop.xlane.xlu1 %822 }
 0x377   : > { %1982 = vrcp.f32 %v823_v26 }
 0x378   : > { %v825_v27 = vpop.xlane.xlu0 %824 }
 0x379   : > { %1984 = vrcp.f32 %v825_v27 }
 0x37a   : > { %v1249_v31 = vpop.xlane.xlu1 %1248 }
 0x37b   : > { %v1273_v6 = vsub.f32 %v2468_v29, %v1249_v31 }
 0x37c   : > { %v1251_v18 = vpop.xlane.xlu0 %1250 }
 0x37d   : > { %v1296_v21 = vmul.f32 1.442695, %v1273_v6  ;;  %v1274_v34 = vsub.f32 %v2472_v50, %v1251_v18 }
 0x37e   : > { %v827_v15 = vpop.xlane.xlu1 %826 }
 0x37f   : > { %v1981_v43 = vpop.eup %1980  ;;  %1986 = vpow2.f32 %v1296_v21  ;;  %v1298_v10 = vmul.f32 1.442695, %v1274_v34 }
 0x380   : > { %1988 = vrcp.f32 %v827_v15  ;;  %v1255_v45 = vpop.xlane.xlu0 %1254  ;;  %v868_v60 = vmul.f32 %v1981_v43, %v2457_v32 }
 0x381   : > { %v1983_v28 = vpop.eup %1982  ;;  %v1276_v54 = vsub.f32 %v2480_v53, %v1255_v45 }
 0x382   : > { %v1253_v58 = vpop.xlane.xlu1 %1252  ;;  %v869_v30 = vmul.f32 %v1983_v28, %v2461_v22 }
 0x383   : > { %v1302_v2 = vmul.f32 1.442695, %v1276_v54  ;;  %v1275_v12 = vsub.f32 %v2484_v61, %v1253_v58  ;;  %v1985_v50 = vpop.eup %1984 }
 0x384   : > { %v829_v29 = vpop.xlane.xlu0 %828  ;;  %v884_v3 = vpack.c.bf16 %v869_v30, %v868_v60  ;;  %v870_v61 = vmul.f32 %v1985_v50, %v2465_v25 }
 0x385   : > { %1990 = vpow2.f32 %v1302_v2  ;;  %v1300_v32 = vmul.f32 1.442695, %v1275_v12 }
 0x386   : > { %1992 = vrcp.f32 %v829_v29  ;;  %1737 = vmatpush3.bf16.xpose.msra.mxu0 %v884_v3  ;;  %v831_v52 = vpop.xlane.xlu1 %830 }
 0x387   : > { %1738 = vmatprep.subr.bf16.mxu0 %v2158_v0  ;;  %1994 = vrcp.f32 %v831_v52 }
 0x388   : > { %v833_v53 = vpop.xlane.xlu0 %832  ;;  %1996 = vpow2.f32 %v1298_v10 }
 0x389   : > { %v2593_v5 = vpop.eup %1986  ;;  %1998 = vpow2.f32 %v1300_v32 }
 0x38a   : > { %v1989_v22 = vpop.eup %1988  ;;  %v1257_v38 = vpop.xlane.xlu1 %1256  ;;  %1328 = vadd.xlane.f32.xlu1 %v2593_v5  ;;  %2000 = vrcp.f32 %v833_v53 }
 0x38b   : > { %v1277_v56 = vsub.f32 %v2501_v14, %v1257_v38  ;;  %v871_v37 = vmul.f32 %v1989_v22, %v2477_v51 }
 0x38c   : > { %v1259_v16 = vpop.xlane.xlu0 %1258 }
 0x38d   : > { %v1304_v55 = vmul.f32 1.442695, %v1277_v56  ;;  %v1278_v19 = vsub.f32 %v2507_v17, %v1259_v16  ;;  %v885_v24 = vpack.c.bf16 %v871_v37, %v870_v61 }
 0x38e   : > { %v835_v7 = vpop.xlane.xlu1 %834 }
 0x38f   : > { %v2600_v26 = vpop.eup %1990  ;;  %2002 = vpow2.f32 %v1304_v55  ;;  %v1306_v27 = vmul.f32 1.442695, %v1278_v19  ;;  %1739 = vmatpush3.bf16.xpose.msra.mxu0 %v885_v24 }
 0x390   : > { %v1993_v31 = vpop.eup %1992  ;;  %2004 = vrcp.f32 %v835_v7  ;;  %v1263_v14 = vpop.xlane.xlu0 %1262  ;;  %1334 = vadd.xlane.f32.xlu1 %v2600_v26  ;;  %1740 = vmatprep.subr.bf16.mxu0 %v2158_v0 }
 0x391   : > { %2006 = vpow2.f32 %v1306_v27  ;;  %v1280_v25 = vsub.f32 %v2517_v47, %v1263_v14  ;;  %v1995_v51 = vpop.eup %1994  ;;  %v872_v21 = vmul.f32 %v1993_v31, %v2489_v62 }
 0x392   : > { %v1261_v17 = vpop.xlane.xlu1 %1260  ;;  %v2605_v6 = vpop.eup %1996  ;;  %v873_v15 = vmul.f32 %v1995_v51, %v2493_v11 }
 0x393   : > { %v1310_v18 = vmul.f32 1.442695, %v1280_v25  ;;  %v2610_v34 = vpop.eup %1998  ;;  %v1279_v60 = vsub.f32 %v2523_v39, %v1261_v17 }
 0x394   : > { %v837_v43 = vpop.xlane.xlu0 %836  ;;  %1330 = vadd.xlane.f32.xlu1 %v2605_v6  ;;  %v886_v45 = vpack.c.bf16 %v873_v15, %v872_v21  ;;  %v2001_v47 = vpop.eup %2000 }
 0x395   : > { %2008 = vpow2.f32 %v1310_v18  ;;  %v874_v29 = vmul.f32 %v2001_v47, %v2497_v13  ;;  %v1308_v53 = vmul.f32 1.442695, %v1279_v60 }
 0x396   : > { %2010 = vrcp.f32 %v837_v43  ;;  %v839_v28 = vpop.xlane.xlu1 %838  ;;  %v297_v43 = vld [vmem:[%s2282_s10 + $0x28] sm:$0xff]  ;;  %s2066_s10 = sshll.u32 %s2162_s9, 4  ;;  %s2067_s10 = int_to_ptr.vmem [resolvable:$false] %s2066_s10 }
 0x397   : > { %1741 = vmatpush3.bf16.xpose.msra.mxu0 %v886_v45  ;;  %2012 = vrcp.f32 %v839_v28  ;;  %s2068_s11 = scalar_lea.vmem %s2067_s10, 512  ;;  %p2069_p5 = scmp.lt.s32.totalorder %s2682_s18, %s2067_s10 }
 0x398   : > { %1332 = vadd.xlane.f32.xlu1 %v2610_v34  ;;  %1742 = vmatprep.subr.bf16.mxu0 %v2158_v0  ;;  %v841_v30 = vpop.xlane.xlu0 %840  ;;  %p2070_p6 = scmp.lt.s32.totalorder %s2068_s11, %s2062_s19 }
 0x399   : > { %v2614_v54 = vpop.eup %2002  ;;  %2014 = vrcp.f32 %v841_v30 }
 0x39a   : > { %v2005_v62 = vpop.eup %2004  ;;  %v1265_v11 = vpop.xlane.xlu1 %1264  ;;  %p2071_p7 = por %p2070_p6, %p2069_p5 }
 0x39b   : > { %v2616_v58 = vpop.eup %2006  ;;  %v1281_v2 = vsub.f32 %v2538_v35, %v1265_v11  ;;  %v875_v3 = vmul.f32 %v2005_v62, %v2512_v4 }
 0x39c   : > { %1338 = vadd.xlane.f32.xlu0 %v2616_v58  ;;  %1336 = vadd.xlane.f32.xlu1 %v2614_v54  ;;  %v845_v35 = vpop.xlane.xlu0 %844  ;;  %p2072_p9 = pnand %p2071_p7, %p2065_p4 }
 0x39d   : > { %v1312_v10 = vmul.f32 1.442695, %v1281_v2  ;;  %v887_v12 = vpack.c.bf16 %v875_v3, %v874_v29 }
 0x39e   : > { %v843_v52 = vpop.xlane.xlu1 %842 }
 0x39f   : > { %v2624_v50 = vpop.eup %2008  ;;  %2016 = vpow2.f32 %v1312_v10  ;;  %1743 = vmatpush3.bf16.xpose.msra.mxu0 %v887_v12 }
 0x3a0   : > { %v2011_v39 = vpop.eup %2010  ;;  %2018 = vrcp.f32 %v843_v52  ;;  %1342 = vadd.xlane.f32.xlu1 %v2624_v50  ;;  %1744 = vmatprep.subr.bf16.mxu0 %v2158_v0  ;;  %v849_v55 = vpop.xlane.xlu0 %848 }
 0x3a1   : > { %v2013_v13 = vpop.eup %2012  ;;  %2020 = vpow2.f32 %v1308_v53  ;;  %v876_v32 = vmul.f32 %v2011_v39, %v2527_v49 }
 0x3a2   : > { %v847_v4 = vpop.xlane.xlu1 %846  ;;  %v877_v22 = vmul.f32 %v2013_v13, %v2531_v46 }
 0x3a3   : > { %2022 = vrcp.f32 %v847_v4  ;;  %v2015_v56 = vpop.eup %2014 }
 0x3a4   : > { %v888_v38 = vpack.c.bf16 %v877_v22, %v876_v32  ;;  %2024 = vrcp.f32 %v845_v35  ;;  %v878_v19 = vmul.f32 %v2015_v56, %v2534_v9 }
 0x3a6   : > { %v851_v37 = vpop.xlane.xlu1 %850 }
 0x3a7   : > { %1745 = vmatpush3.bf16.xpose.msra.mxu0 %v888_v38  ;;  %2026 = vrcp.f32 %v851_v37 }
 0x3a8   : > { %1746 = vmatprep.subr.bf16.mxu0 %v2158_v0  ;;  %2028 = vrcp.f32 %v849_v55 }
 0x3a9   : > { %v2631_v61 = vpop.eup %2016 }
 0x3aa   : > { %v2019_v16 = vpop.eup %2018  ;;  %1344 = vadd.xlane.f32.xlu1 %v2631_v61 }
 0x3ab   : > { %v879_v49 = vmul.f32 %v2019_v16, %v2545_v36  ;;  %v2636_v46 = vpop.eup %2020 }
 0x3ad   : > { %v889_v24 = vpack.c.bf16 %v879_v49, %v878_v19  ;;  %v2023_v7 = vpop.eup %2022 }
 0x3ae   : > { %1340 = vadd.xlane.f32.xlu1 %v2636_v46  ;;  %v2025_v27 = vpop.eup %2024  ;;  %v881_v31 = vmul.f32 %v2023_v7, %v2551_v41 }
 0x3af   : > { %1747 = vmatpush3.bf16.xpose.msra.mxu0 %v889_v24  ;;  %v880_v14 = vmul.f32 %v2025_v27, %v2542_v48 }
 0x3b0   : > { %1748 = vmatprep.subr.bf16.mxu0 %v2158_v0 }
 0x3b1   : > { %v890_v9 = vpack.c.bf16 %v881_v31, %v880_v14  ;;  %v2027_v25 = vpop.eup %2026 }
 0x3b2   : > { %v2029_v51 = vpop.eup %2028  ;;  %v883_v17 = vmul.f32 %v2027_v25, %v2554_v8 }
 0x3b3   : > { %v882_v21 = vmul.f32 %v2029_v51, %v2548_v40 }
 0x3b4   : > { %v1315_v18 = vpop.xlane.xlu0 %1314 }
 0x3b5   : > { %v891_v45 = vpack.c.bf16 %v883_v17, %v882_v21 }
 0x3b6   : > { %v1317_v36 = vpop.xlane.xlu1 %1316 }
 0x3b7   : > { %1749 = vmatpush3.bf16.xpose.msra.mxu0 %v890_v9  ;;  %2030 = vrcp.f32 %v1317_v36 }
 0x3b8   : > { %1750 = vmatprep.subr.bf16.mxu0 %v2158_v0  ;;  %2032 = vrcp.f32 %v1315_v18  ;;  %v1319_v48 = vpop.xlane.xlu0 %1318 }
 0x3ba   : > { %v1321_v15 = vpop.xlane.xlu1 %1320 }
 0x3bb   : > { %2034 = vrcp.f32 %v1321_v15 }
 0x3bc   : > { %2036 = vrcp.f32 %v1319_v48 }
 0x3be   : > { %v1327_v41 = vpop.xlane.xlu1 %1326 }
 0x3bf   : > { %1751 = vmatpush3.bf16.xpose.msra.mxu0 %v891_v45  ;;  %325 = vperm.xlu1 %1926, %v297_v43  }
 0x3c0   : > { %1792 = vmatprep.subr.bf16.mxu0 %v2158_v0  ;;  %v1323_v28 = vpop.xlane.xlu0 %1322 }
 0x3c1   : > { %v2031_v47 = vpop.eup %2030 }
 0x3c2   : > { %v2033_v62 = vpop.eup %2032  ;;  %v1325_v8 = vpop.xlane.xlu1 %1324  ;;  %v1363_v60 = vmul.f32 %v2031_v47, %v2567_v57 }
 0x3c3   : > { %v1362_v30 = vmul.f32 %v2033_v62, %v2564_v42  ;;  %2038 = vrcp.f32 %v1325_v8 }
 0x3c4   : > { %2040 = vrcp.f32 %v1323_v28 }
 0x3c5   : > { %v1378_v29 = vpack.c.bf16 %v1363_v60, %v1362_v30  ;;  %v2035_v3 = vpop.eup %2034  ;;  %2042 = vrcp.f32 %v1327_v41 }
 0x3c6   : > { %v2037_v10 = vpop.eup %2036  ;;  %v1365_v12 = vmul.f32 %v2035_v3, %v2573_v1 }
 0x3c7   : > { %v1364_v57 = vmul.f32 %v2037_v10, %v2570_v59 }
 0x3c8   : > { %v311_v11 = vpop.permute.xlu0 %310 }
 0x3c9   : > { %v420_v40 = vadd.f32 %v2307_v33, %v311_v11  ;;  %v1379_v33 = vpack.c.bf16 %v1365_v12, %v1364_v57 }
 0x3cb   : > { %v440_v2 = vpack.c.bf16 %v420_v40, %v420_v40 }
 0x3cd   : > { %1753 = vmatmul.mubr.bf16.vlgmr.msra.gmra.mrb[12].mxu0 %v440_v2  ;;  %v2039_v52 = vpop.eup %2038 }
 0x3ce   : > { %1793 = vmatpush3.bf16.xpose.msra.mxu0 %v1378_v29  ;;  %1808 = vmatprep.mubr.msk.bf16.mxu0 %vm2159_vm0, %v2158_v0  ;;  %v2041_v42 = vpop.eup %2040  ;;  %v1367_v53 = vmul.f32 %v2039_v52, %v2582_v23 }
 0x3cf   : > { %1794 = vmatprep.subr.bf16.mxu0 %v2158_v0  ;;  %v1366_v39 = vmul.f32 %v2041_v42, %v2579_v20  ;;  %v2043_v35 = vpop.eup %2042 }
 0x3d0   : > { %v1368_v22 = vmul.f32 %v2043_v35, %v2576_v63 }
 0x3d1   : > { %v1380_v13 = vpack.c.bf16 %v1367_v53, %v1366_v39 }
 0x3d6   : > { %1795 = vmatpush3.bf16.xpose.msra.mxu0 %v1379_v33 }
 0x3d7   : > { %1796 = vmatprep.subr.bf16.mxu0 %v2158_v0 }
 0x3de   : > { %1797 = vmatpush3.bf16.xpose.msra.mxu0 %v1380_v13 }
 0x3df   : > { %1798 = vmatprep.subr.bf16.mxu0 %v2158_v0 }
 0x417   : > { %v1329_v4 = vpop.xlane.xlu1 %1328 }
 0x418   : > { %2044 = vrcp.f32 %v1329_v4 }
 0x41d   : > { %v1335_v1 = vpop.xlane.xlu1 %1334 }
 0x421   : > { %v1331_v59 = vpop.xlane.xlu1 %1330 }
 0x422   : > { %v2045_v32 = vpop.eup %2044  ;;  %2046 = vrcp.f32 %v1331_v59 }
 0x423   : > { %v1369_v38 = vmul.f32 %v2045_v32, %v2593_v5 }
 0x425   : > { %v1333_v56 = vpop.xlane.xlu1 %1332  ;;  %v1381_v23 = vpack.c.bf16 %v1369_v38, %v1368_v22 }
 0x426   : > { %2048 = vrcp.f32 %v1333_v56 }
 0x427   : > { %1799 = vmatpush3.bf16.xpose.msra.mxu0 %v1381_v23 }
 0x428   : > { %1800 = vmatprep.subr.bf16.mxu0 %v2158_v0 }
 0x429   : > { %v1337_v20 = vpop.xlane.xlu1 %1336  ;;  %v1339_v7 = vpop.xlane.xlu0 %1338 }
 0x42a   : > { %2050 = vrcp.f32 %v1337_v20 }
 0x42b   : > { %2052 = vrcp.f32 %v1335_v1 }
 0x42c   : > { %v2047_v37 = vpop.eup %2046  ;;  %2054 = vrcp.f32 %v1339_v7 }
 0x42d   : > { %v1370_v55 = vmul.f32 %v2047_v37, %v2605_v6  ;;  %v1343_v49 = vpop.xlane.xlu1 %1342 }
 0x430   : > { %v2049_v16 = vpop.eup %2048 }
 0x431   : > { %v1371_v19 = vmul.f32 %v2049_v16, %v2610_v34 }
 0x433   : > { %v1382_v63 = vpack.c.bf16 %v1371_v19, %v1370_v55 }
 0x434   : > { %v2051_v24 = vpop.eup %2050 }
 0x435   : > { %1801 = vmatpush3.bf16.xpose.msra.mxu0 %v1382_v63  ;;  %v2053_v5 = vpop.eup %2052  ;;  %v1373_v31 = vmul.f32 %v2051_v24, %v2614_v54 }
 0x436   : > { %1802 = vmatprep.subr.bf16.mxu0 %v2158_v0  ;;  %v1372_v14 = vmul.f32 %v2053_v5, %v2600_v26  ;;  %v2055_v6 = vpop.eup %2054 }
 0x437   : > { %v1345_v27 = vpop.xlane.xlu1 %1344  ;;  %v1374_v36 = vmul.f32 %v2055_v6, %v2616_v58 }
 0x438   : > { %v1383_v25 = vpack.c.bf16 %v1373_v31, %v1372_v14 }
 0x43b   : > { %v1341_v9 = vpop.xlane.xlu1 %1340 }
 0x43c   : > { %2056 = vrcp.f32 %v1341_v9 }
 0x43d   : > { %1803 = vmatpush3.bf16.xpose.msra.mxu0 %v1383_v25  ;;  %2058 = vrcp.f32 %v1345_v27 }
 0x43e   : > { %1804 = vmatprep.subr.bf16.mxu0 %v2158_v0  ;;  %2060 = vrcp.f32 %v1343_v49 }
 0x43f   : > { %v326_v15 = vpop.permute.xlu1 %325 }
 0x440   : > { %v431_v45 = vadd.f32 %v2319_v44, %v326_v15 }
 0x442   : > { %v935_v58 = vpack.c.bf16 %v431_v45, %v431_v45 }
 0x446   : > { %v2057_v34 = vpop.eup %2056 }
 0x447   : > { %v1375_v51 = vmul.f32 %v2057_v34, %v2636_v46  ;;  %v2059_v54 = vpop.eup %2058 }
 0x448   : > { %v2061_v26 = vpop.eup %2060  ;;  %v1377_v18 = vmul.f32 %v2059_v54, %v2631_v61 }
 0x449   : > { %v1384_v17 = vpack.c.bf16 %v1375_v51, %v1374_v36  ;;  %v1376_v21 = vmul.f32 %v2061_v26, %v2624_v50 }
 0x44b   : > { %1805 = vmatpush3.bf16.xpose.msra.mxu0 %v1384_v17  ;;  %v1385_v43 = vpack.c.bf16 %v1377_v18, %v1376_v21 }
 0x44c   : > { %1806 = vmatprep.subr.bf16.mxu0 %v2158_v0 }
 0x453   : > { %1807 = vmatpush3.bf16.xpose.msra.mxu0 %v1385_v43 }
 0x45a   : > { %1809 = vmatmul.mubr.bf16.vlgmr.msra.gmra.mrb[16].mxu0 %v935_v58 }
 0x4a0   : > { %v926_v46 = vpop.f32.mrb[12].mxu0 }
 0x4a1   : > { %932 = vst [vmem:[%s252_s8] sm:$0xff] %v926_v46  ;;  %v1754_v48 = vpop.f32.mrb[13].mxu0 }
 0x4a2   : > { %v929_v0 = vpop.f32.mrb[14].mxu0 }
 0x4a3   : > { %v1755_v61 = vpop.f32.mrb[15].mxu0 }
 0x52d   : > { %v1420_v44 = vpop.f32.mrb[16].mxu0 }
 0x52e   : > { %1611 = vst [vmem:[%s252_s8 + $0x8] sm:$0xff] %v1420_v44  ;;  %v1810_v50 = vpop.f32.mrb[17].mxu0 }
 0x52f   : > { %v1423_v41 = vpop.f32.mrb[18].mxu0 }
 0x530   : > { %2075 = shalt.err (!%p2072_p9)
}
 0x531   : > { %s2076_s12 = scalar_lea.hbm %s2680_s5, 256  ;;  %s2080_s26 = scalar_lea.hbm %s2740_s4, 2048 }
 0x532   : > { %p2077_p10 = scmp.ne.s32.totalorder %s2680_s5, %s2076_s12  ;;  %p2081_p13 = scmp.lt.u32.totalorder %s2680_s5, %s2740_s4 }
 0x533   : > { %p2082_p0 = scmp.lt.u32.totalorder %s2080_s26, %s2076_s12  ;;  %p2084_p2 = scmp.lt.u32.totalorder %s2076_s12, %s2680_s5 }
 0x534   : > { %p2078_p11 = pnand %p2077_p10, %p2241_p3 }
 0x535   : > { %p2083_p1 = por %p2082_p0, %p2081_p13 }
 0x536   : > { %p2079_p12 = pneg %p2078_p11 }
 0x537   : > { %p2085_p4 = por %p2084_p2, %p2083_p1 }
 0x539   : > { %p2086_p5 = pnand %p2085_p4, %p2079_p12 }
 0x53b   : > { %2089 = shalt.err (!%p2086_p5)
}
 0x53c   : > { %s2163_s23 = smov 128   ;;  %s2164_s24 = smov 8   ;;  %v1811_v28 = vpop.f32.mrb[19].mxu0 }
 0x53d   : > { %1848 = dma.vmem_to_hbm [thread:$0]  (%p2241_p3), %s2682_s18, 256, %s2680_s5, %s2684_s6, %s2163_s23, %s2163_s23, %s2164_s24  }
 0x53e PF: > { %p1854_p6 = scmp.ge.s32.totalorder %s2156_s22, 2  ;;  %s1459_s27 = sand.u32 1, %s2128_s15  }
 0x53f   : > { %s1460_s30 = scalar_lea.sflag [#allocation3], %s1459_s27 }
 0x540   : > { %p1851_p7 = pnand %p1854_p6, %p2250_p8 }
 0x542   : > { %2123 = dma.done.wait (!%p1851_p7), %s1460_s30, 256  }
 0x543   : > { %2125 = vsyncadd (!%p1851_p7), %s1460_s30, 4294967040  ;;  %s17_s22 = sadd.s32 1, %s2156_s22   ;;  %s2747_s28 = sld [smem:[#allocation5_spill]] }
 0x544   : > { %p14_p9 = scmp.ge.s32.totalorder %s17_s22, 10   ;;  %s2748_s15 = smov %s2132_s16 }
 0x545   : > { %s2749_s16 = smov %s2136_s17  ;;  %s2750_s17 = smov %s2259_s7 }
 0x546   : > { %s2751_s18 = smov %s2148_s20  ;;  %s2752_s19 = smov %s2152_s21 }
 0x547   : > { %s2753_s20 = smov %s2756_s25  ;;  %16 = sbr.rel (!%p14_p9) target bundleno = 7 (0x7), region = 82 }
 0x549   : > { %s2754_s21 = smov %s2747_s28 }
 0x54e   :  { %1465 = vsyncpa [#allocation3], 1 }
 0x54f   :  { %1467 = vsyncpa [#allocation3 + $0x1], 1 }

</bundles_post_ra>
